<compile_context>
chip_gen: v5e
topology: v5e:2x2
jax: 0.10.0
libtpu: 0.0.40
codegen_flags: <defaults>
</compile_context>

<pallas_src>
import jax
import jax.numpy as jnp
import numpy as np
from jax.experimental import pallas as pl
from jax.experimental.pallas import tpu as pltpu

# ----- model dims (lane/sublane friendly) -----
B  = 256   # example batch (2 grid steps of TM=128)
D0 = 128   # layer0 size (input features)
D1 = 256   # layer1 size (hidden)
D2 = 128   # layer2 size (latent: mu / logvar)
TM = 128   # rows per grid step


def encoder_kernel(x_ref, w0_ref, b0_ref, wcat_ref, bcat_ref, out_ref):
    """Global-Gaussian encoder forward for one TM-row tile.

    h   = relu(x @ W0 + b0)                 # self.FCs (single hidden FC, ReLU)
    out = h @ [Wmu || Wlogvar] + [bmu||blv] # fused FCmu / FClogvar (identity act.)
    """
    # Stage 1: bf16 x / W0 on the MXU, f32 accumulate, f32 bias + ReLU.
    h = jnp.dot(x_ref[...], w0_ref[...],
                preferred_element_type=jnp.float32) + b0_ref[...]
    h = jnp.maximum(h, 0.0)
    # Stage 2: single fused (TM, D1) @ (D1, 2*D2) matmul, bf16 inputs, f32 acc.
    out = jnp.dot(h.astype(jnp.bfloat16), wcat_ref[...],
                  preferred_element_type=jnp.float32) + bcat_ref[...]
    out_ref[...] = out.astype(out_ref.dtype)


def encoder_forward(x, w0, b0, wcat, bcat):
    """Batched wrapper: grid over row tiles, weights resident across steps."""
    b, d0 = x.shape
    d1 = w0.shape[1]
    d2x2 = wcat.shape[1]

    # Pad batch up to a multiple of the row tile.
    b_pad = ((b + TM - 1) // TM) * TM
    if b_pad != b:
        x = jnp.pad(x, ((0, b_pad - b), (0, 0)))

    out = pl.pallas_call(
        encoder_kernel,
        out_shape=jax.ShapeDtypeStruct((b_pad, d2x2), jnp.float32),
        grid=(b_pad // TM,),
        in_specs=[
            pl.BlockSpec((TM, d0),   lambda i: (i, 0)),   # x tile (bf16)
            pl.BlockSpec((d0, d1),   lambda i: (0, 0)),   # W0 (bf16, resident)
            pl.BlockSpec((1, d1),    lambda i: (0, 0)),   # b0 (f32)
            pl.BlockSpec((d1, d2x2), lambda i: (0, 0)),   # [Wmu||Wlv] (bf16, resident)
            pl.BlockSpec((1, d2x2),  lambda i: (0, 0)),   # [bmu||blv] (f32)
        ],
        out_specs=pl.BlockSpec((TM, d2x2), lambda i: (i, 0)),
        compiler_params=pltpu.CompilerParams(
            dimension_semantics=("parallel",)),           # v7x dual-TC sharding
    )(x, w0, b0, wcat, bcat)

    out = out[:b]
    d2 = d2x2 // 2
    return out[:, :d2], out[:, d2:]                       # (mu, logvar)


def init_params(key):
    """Deterministic init mimicking torch.nn.Linear default (U[-1/sqrt(fan_in), +]).

    Weights returned in bf16 (streamed dtype), biases in f32.
    The mu / logvar heads are concatenated along the output axis.
    """
    ks = jax.random.split(key, 6)

    def linear(kw, kb, fan_in, fan_out):
        bound = 1.0 / np.sqrt(fan_in)
        w = jax.random.uniform(kw, (fan_in, fan_out), jnp.float32, -bound, bound)
        b = jax.random.uniform(kb, (1, fan_out), jnp.float32, -bound, bound)
        return w, b

    w0, b0   = linear(ks[0], ks[1], D0, D1)
    wmu, bmu = linear(ks[2], ks[3], D1, D2)
    wlv, blv = linear(ks[4], ks[5], D1, D2)

    wcat = jnp.concatenate([wmu, wlv], axis=1)   # (D1, 2*D2)
    bcat = jnp.concatenate([bmu, blv], axis=1)   # (1, 2*D2)
    return w0.astype(jnp.bfloat16), b0, wcat.astype(jnp.bfloat16), bcat


def reference_forward(x, w0, b0, wcat, bcat):
    """Pure-JAX reference with identical dtypes / compute pattern."""
    h = jnp.maximum(
        jnp.dot(x, w0, preferred_element_type=jnp.float32) + b0, 0.0)
    out = jnp.dot(h.astype(jnp.bfloat16), wcat,
                  preferred_element_type=jnp.float32) + bcat
    d2 = out.shape[1] // 2
    return out[:, :d2], out[:, d2:]


# TODO(synk): 'window-based' / 'hybrid' shapes and multi-head VQ branches of the
# original module are per-window module lists; only the 'global' Gaussian path is
# implemented here.

if __name__ == "__main__":
    key = jax.random.PRNGKey(0)
    k_x, k_p = jax.random.split(key)
    x = jax.random.normal(k_x, (B, D0), jnp.float32).astype(jnp.bfloat16)
    w0, b0, wcat, bcat = init_params(k_p)

    o_mu, o_logvar = jax.jit(encoder_forward)(x, w0, b0, wcat, bcat)
    jax.block_until_ready((o_mu, o_logvar))

    r_mu, r_lv = reference_forward(x, w0, b0, wcat, bcat)
    np.testing.assert_allclose(np.asarray(o_mu), np.asarray(r_mu),
                               rtol=1e-2, atol=1e-2)
    np.testing.assert_allclose(np.asarray(o_logvar), np.asarray(r_lv),
                               rtol=1e-2, atol=1e-2)

    print("KERNEL_OK")
</pallas_src>

<mosaic_0001>
module attributes {stable_mosaic.version = 11 : i64} {
  func.func @encoder_kernel(%arg0: i32, %arg1: memref<128x128xbf16, #tpu.memory_space<vmem>>, %arg2: memref<128x256xbf16, #tpu.memory_space<vmem>>, %arg3: memref<1x256xf32, #tpu.memory_space<vmem>>, %arg4: memref<256x256xbf16, #tpu.memory_space<vmem>>, %arg5: memref<1x256xf32, #tpu.memory_space<vmem>>, %arg6: memref<128x256xf32, #tpu.memory_space<vmem>>) attributes {dimension_semantics = [#tpu.dimension_semantics<parallel>], iteration_bounds = array<i64: 2>, scalar_prefetch = 0 : i64, scratch_operands = 0 : i64, tpu.core_type = #tpu.core_type<tc>, window_params = [{transform_indices = @transform_0, window_bounds = array<i64: 128, 128>}, {pipeline_mode = #tpu.pipeline_mode<synchronous>, transform_indices = @transform_1, window_bounds = array<i64: 128, 256>}, {pipeline_mode = #tpu.pipeline_mode<synchronous>, transform_indices = @transform_2, window_bounds = array<i64: 1, 256>}, {pipeline_mode = #tpu.pipeline_mode<synchronous>, transform_indices = @transform_3, window_bounds = array<i64: 256, 256>}, {pipeline_mode = #tpu.pipeline_mode<synchronous>, transform_indices = @transform_4, window_bounds = array<i64: 1, 256>}, {transform_indices = @transform_5, window_bounds = array<i64: 128, 256>}]} {
    %c0 = arith.constant 0 : index
    %c0_0 = arith.constant 0 : index
    %0 = vector.load %arg1[%c0, %c0_0] : memref<128x128xbf16, #tpu.memory_space<vmem>>, vector<128x128xbf16>
    %c0_1 = arith.constant 0 : index
    %c0_2 = arith.constant 0 : index
    %1 = vector.load %arg2[%c0_1, %c0_2] : memref<128x256xbf16, #tpu.memory_space<vmem>>, vector<128x256xbf16>
    %cst = arith.constant dense<0.000000e+00> : vector<128x256xf32>
    %2 = tpu.matmul %0, %1, %cst {dimension_numbers = #tpu.dot_dimension_numbers<[1], [0], [0], [1], [0, 0, 1, 1], [], []>} : vector<128x128xbf16>, vector<128x256xbf16>, vector<128x256xf32> -> vector<128x256xf32>
    %c0_3 = arith.constant 0 : index
    %c0_4 = arith.constant 0 : index
    %3 = vector.load %arg3[%c0_3, %c0_4] : memref<1x256xf32, #tpu.memory_space<vmem>>, vector<1x256xf32>
    %4 = vector.broadcast %3 : vector<1x256xf32> to vector<128x256xf32>
    %5 = arith.addf %2, %4 : vector<128x256xf32>
    %cst_5 = arith.constant 0.000000e+00 : f32
    %6 = vector.broadcast %cst_5 : f32 to vector<128x256xf32>
    %7 = arith.maximumf %5, %6 : vector<128x256xf32>
    %8 = arith.truncf %7 : vector<128x256xf32> to vector<128x256xbf16>
    %c0_6 = arith.constant 0 : index
    %c0_7 = arith.constant 0 : index
    %9 = vector.load %arg4[%c0_6, %c0_7] : memref<256x256xbf16, #tpu.memory_space<vmem>>, vector<256x256xbf16>
    %cst_8 = arith.constant dense<0.000000e+00> : vector<128x256xf32>
    %10 = tpu.matmul %8, %9, %cst_8 {dimension_numbers = #tpu.dot_dimension_numbers<[1], [0], [0], [1], [0, 0, 1, 1], [], []>} : vector<128x256xbf16>, vector<256x256xbf16>, vector<128x256xf32> -> vector<128x256xf32>
    %c0_9 = arith.constant 0 : index
    %c0_10 = arith.constant 0 : index
    %11 = vector.load %arg5[%c0_9, %c0_10] : memref<1x256xf32, #tpu.memory_space<vmem>>, vector<1x256xf32>
    %12 = vector.broadcast %11 : vector<1x256xf32> to vector<128x256xf32>
    %13 = arith.addf %10, %12 : vector<128x256xf32>
    %c0_11 = arith.constant 0 : index
    %c0_12 = arith.constant 0 : index
    %14 = vector.load %arg6[%c0_11, %c0_12] : memref<128x256xf32, #tpu.memory_space<vmem>>, vector<128x256xf32>
    tpu.vector_store %arg6[%c0_11, %c0_12], %13 {strides = array<i32>} : memref<128x256xf32, #tpu.memory_space<vmem>>, vector<128x256xf32>,
    return
  }
  func.func @transform_0(%arg0: i32) -> (i32, i32) {
    %c0_i32 = arith.constant 0 : i32
    %c0_i32_0 = arith.constant 0 : i32
    return %arg0, %c0_i32 : i32, i32
  }
  func.func @transform_1(%arg0: i32) -> (i32, i32) {
    %c0_i32 = arith.constant 0 : i32
    %c0_i32_0 = arith.constant 0 : i32
    %c0_i32_1 = arith.constant 0 : i32
    return %c0_i32, %c0_i32_0 : i32, i32
  }
  func.func @transform_2(%arg0: i32) -> (i32, i32) {
    %c0_i32 = arith.constant 0 : i32
    %c0_i32_0 = arith.constant 0 : i32
    %c0_i32_1 = arith.constant 0 : i32
    return %c0_i32, %c0_i32_0 : i32, i32
  }
  func.func @transform_3(%arg0: i32) -> (i32, i32) {
    %c0_i32 = arith.constant 0 : i32
    %c0_i32_0 = arith.constant 0 : i32
    %c0_i32_1 = arith.constant 0 : i32
    return %c0_i32, %c0_i32_0 : i32, i32
  }
  func.func @transform_4(%arg0: i32) -> (i32, i32) {
    %c0_i32 = arith.constant 0 : i32
    %c0_i32_0 = arith.constant 0 : i32
    %c0_i32_1 = arith.constant 0 : i32
    return %c0_i32, %c0_i32_0 : i32, i32
  }
  func.func @transform_5(%arg0: i32) -> (i32, i32) {
    %c0_i32 = arith.constant 0 : i32
    %c0_i32_0 = arith.constant 0 : i32
    return %arg0, %c0_i32 : i32, i32
  }
}

</mosaic_0001>

<bundles_post_ra>
// kernel: encoder_forward.1
= control target key start
LH: loop header
LB: loop body
LE: loop exit
PB: predicated region body
PF: predicated region fallthrough
CT: control target
= control target key end

     0   :  { %10 = vsyncpa [#allocation3], 0  ;;  %s1973_s0 = inlined_call_operand.hbm [shape: bf16[256,128], index: 0, kind: input, shape index: {}]   ;;  %s1974_s1 = inlined_call_operand.hbm [shape: bf16[128,256], index: 1, kind: input, shape index: {}]   ;;  %s1975_s2 = inlined_call_operand.hbm [shape: f32[1,256], index: 2, kind: input, shape index: {}]   ;;  %s1976_s3 = inlined_call_operand.hbm [shape: bf16[256,256], index: 3, kind: input, shape index: {}]   ;;  %s1977_s4 = inlined_call_operand.vmem [shape: f32[1,256], index: 4, kind: input, shape index: {}]   ;;  %s1978_s5 = inlined_call_operand.vmem [shape: f32[256,256], index: 5, kind: output, shape index: {}]  }
   0x1   :  { %12 = vsyncpa [#allocation3 + $0x1], 0 }
   0x2   :  { %13 = vsyncpa [#allocation5], 0 }
   0x3   :  { %14 = vsyncpa [#allocation8], 0  ;;  %s1728_s18 = smov 0   ;;  %s1730_s19 = smov 0  }
   0x4   :  { %s1732_s20 = smov 0   ;;  %s1734_s21 = smov 0  }
   0x5 LB: > { %s1135_s22 = sadd.s32 4294967295, %s1689_s21   ;;  %p40_p0 = scmp.ne.s32.totalorder %s1681_s19, %s1677_s18  ;;  %s1689_s21 = sphi %s1734_s21, %s1987_s21   ;;  %s1685_s20 = sphi %s1732_s20, %s1986_s20   ;;  %s1681_s19 = sphi %s1730_s19, %s1985_s19   ;;  %s1677_s18 = sphi %s1728_s18, %s1984_s18  }
   0x6   : > { %p1750_p1 = scmp.eq.s32.totalorder %s1135_s22, 0  ;;  %p1137_p2 = scmp.ge.s32.totalorder %s1689_s21, 1 }
   0x7   : > { %p161_p3 = scmp.lt.s32.totalorder %s1689_s21, 3  ;;  %s172_s27 = sshll.u32 %s1974_s1, 4  ;;  %s173_s27 = int_to_ptr.hbm [resolvable:$true] %s172_s27 }
   0x8   : > { %p1758_p4 = por %p1750_p1, %p40_p0  ;;  %s1691_s29 = smov [#allocation4]  }
   0x9   : > { %p1765_p5 = pnand %p1137_p2, %p161_p3  ;;  %s174_s30 = sshll.u32 %s1691_s29, 4  ;;  %s175_s30 = int_to_ptr.vmem [resolvable:$true] %s174_s30 }
   0xa   : > { %s187_s9 = sshll.u32 %s1975_s2, 4  ;;  %s1692_s10 = smov 128   ;;  %s188_s9 = int_to_ptr.hbm [resolvable:$true] %s187_s9 }
   0xb   : > { %p1467_p6 = pneg %p1765_p5  ;;  %s1693_s11 = smov 8  }
   0xc   : > { %s1694_s12 = smov [#allocation6]   ;;  %s198_s16 = sshll.u32 %s1976_s3, 4  ;;  %s199_s16 = int_to_ptr.hbm [resolvable:$true] %s198_s16 }
   0xd   : > { %p1773_p7 = pnand %p1467_p6, %p1750_p1  ;;  %s189_s13 = sshll.u32 %s1694_s12, 4  ;;  %s190_s13 = int_to_ptr.vmem [resolvable:$true] %s189_s13 }
   0xe   : > { %s1695_s17 = smov [#allocation7]   ;;  %s1788_s25 = sadd.s32 1, %s1689_s21  }
   0xf   : > { %1470 = dma.hbm_to_vmem [thread:$0]  (!%p1773_p7), %s173_s27, 2048, %s175_s30, [#allocation5], %s1692_s10, %s1692_s10, %s1693_s11  }
  0x10   : > { %1473 = dma.hbm_to_vmem [thread:$0]  (!%p1773_p7), %s188_s9, 32, %s190_s13, [#allocation5]  }
  0x11   : > { %s200_s18 = sshll.u32 %s1695_s17, 4  ;;  %s24_s26 = ssub.s32 %s1689_s21, %s1788_s25  ;;  %s201_s18 = int_to_ptr.vmem [resolvable:$true] %s200_s18 }
  0x12   : > { %1476 = dma.hbm_to_vmem [thread:$0]  (!%p1773_p7), %s199_s16, 4096, %s201_s18, [#allocation8], %s1692_s10, %s1692_s10, %s1693_s11  }
  0x13   : > { %s27_s27 = sadd.s32 1, %s1685_s20  ;;  %p25_p8 = scmp.eq.s32.totalorder %s24_s26, 0 }
  0x14   : > { %p34_p9 = scmp.ne.s32.totalorder %s1685_s20, %s1681_s19  ;;  %p35_p10 = scmp.eq.s32.totalorder %s1689_s21, 0 }
  0x15   : > { %p1484_p11 = scmp.lt.s32.totalorder %s1689_s21, 2  ;;  %s217_s30 = sand.u32 1, %s1685_s20  }
  0x16   : > { %s1800_s29 = scalar_select %p25_p8, %s1685_s20, %s27_s27  }
  0x17   : > { %p36_p12 = por %p35_p10, %p34_p9  ;;  %s1142_s7 = sshll.u32 %s217_s30, 6 }
  0x18   : > { %s1379_s8 = sshll.u32 %s1689_s21, 6  ;;  %s221_s14 = scalar_lea.vmem [#allocation2], %s1142_s7 }
  0x19   : > { %s226_s13 = scalar_lea.hbm %s1973_s0, %s1379_s8  ;;  %s229_s6 = sshll.u32 %s221_s14, 4  ;;  %s230_s6 = int_to_ptr.vmem [resolvable:$true] %s229_s6 }
  0x1a   : > { %s227_s15 = sshll.u32 %s226_s13, 4  ;;  %p1807_p13 = pnand %p1484_p11, %p36_p12  ;;  %s228_s15 = int_to_ptr.hbm [resolvable:$true] %s227_s15 }
  0x1b   : > { %s218_s11 = scalar_lea.sflag [#allocation3], %s217_s30  ;;  %s1617_s16 = sshra.s32 %s228_s15, 4  ;;  %s1618_s16 = int_to_ptr.hbm [resolvable:$true] %s1617_s16 }
  0x1c   : > { %s1619_s17 = scalar_lea.hbm %s1618_s16, 64  ;;  %p1621_p2 = pneg %p1807_p13 }
  0x1d   : > { %p1620_p0 = scmp.ne.s32.totalorder %s1618_s16, %s1619_s17  ;;  %s1624_s27 = scalar_lea.hbm %s1973_s0, 128 }
  0x1e   : > { %p1625_p7 = scmp.lt.s32.totalorder %s1618_s16, %s1973_s0  ;;  %p1626_p8 = scmp.lt.s32.totalorder %s1624_s27, %s1619_s17 }
  0x1f   : > { %p1622_p3 = pnand %p1621_p2, %p1620_p0 }
  0x20   : > { %p1627_p9 = por %p1626_p8, %p1625_p7 }
  0x21   : > { %p1623_p6 = pneg %p1622_p3 }
  0x23   : > { %p1628_p10 = pnand %p1627_p9, %p1623_p6 }
  0x25   : > { %1631 = shalt.err (!%p1628_p10)
}
  0x26   : > { %s1696_s30 = smov 64   ;;  %s1697_s9 = smov 4  }
  0x27   : > { %1480 = dma.hbm_to_vmem [thread:$0]  (!%p1807_p13), %s228_s15, 1024, %s230_s6, %s218_s11, %s1696_s30, %s1696_s30, %s1697_s9  }
  0x28   : > { %241 = sbr.rel (%p1765_p5) target bundleno = 481 (0x1e1), region = 40  ;;  %s243_s12 = sand.u32 (!%p1765_p5), 1, %s1681_s19  }
  0x29   : > { %s1146_s13 = sshll.u32 (!%p1765_p5), %s243_s12, 6  ;;  %s244_s14 = scalar_lea.sflag (!%p1765_p5), [#allocation3], %s243_s12 }
  0x2a   : > { %s1824_s18 = scalar_lea.vmem (!%p1765_p5), [#allocation2], %s1146_s13 }
  0x2d   : > { %1664 = dma.done.wait (%p1758_p4), %s244_s14, 1024  }
  0x2e   : > { %1666 = vsyncadd (%p1758_p4), %s244_s14, 4294966272 }
  0x2f   : > { %1668 = dma.done.wait (%p1750_p1), [#allocation5], 2080  }
  0x30   : > { %1670 = vsyncadd (%p1750_p1), [#allocation5], 4294965216 }
  0x31   : > { %1672 = dma.done.wait (%p1750_p1), [#allocation8], 4096  }
  0x32   : > { %1674 = vsyncadd (%p1750_p1), [#allocation8], 4294963200  ;;  %v1243_v0 = vld [vmem:[#allocation4 + $0x70] sm:$0xf]  ;;  %v1404_v1 = vld [vmem:[#allocation4 + $0x74] sm:$0xf0] }
  0x33   : > { %v1403_v2 = vld [vmem:[#allocation4 + $0x74] sm:$0xf]  ;;  %v1244_v3 = vor.u32 %v1404_v1, %v1243_v0  ;;  %v1245_v4 = vld [vmem:[#allocation4 + $0x78] sm:$0xf0]  ;;  %v1235_v5 = vld [vmem:[#allocation4 + $0x60] sm:$0xf] }
  0x34   : > { %v1402_v6 = vld [vmem:[#allocation4 + $0x64] sm:$0xf0]  ;;  %v1248_v7 = vor.u32 %v1403_v2, %v1245_v4  ;;  %v1401_v8 = vld [vmem:[#allocation4 + $0x64] sm:$0xf]  ;;  %v1237_v9 = vld [vmem:[#allocation4 + $0x68] sm:$0xf0] }
  0x35   : > { %465 = vmatpush.bf16.msra.mxu0 %v1244_v3  ;;  %v1236_v10 = vor.u32 %v1402_v6, %v1235_v5  ;;  %1437 = vmatpush.bf16.msra.mxu2 %v1244_v3  ;;  %v1240_v11 = vor.u32 %v1401_v8, %v1237_v9  ;;  %v1227_v12 = vld [vmem:[#allocation4 + $0x50] sm:$0xf]  ;;  %v1400_v13 = vld [vmem:[#allocation4 + $0x54] sm:$0xf0]  ;;  %v1399_v14 = vld [vmem:[#allocation4 + $0x54] sm:$0xf] }
  0x36   : > { %514 = vmatpush.bf16.msra.mxu1 %v1248_v7  ;;  %1445 = vmatpush.bf16.msra.mxu3 %v1248_v7  ;;  %v1229_v15 = vld [vmem:[#allocation4 + $0x58] sm:$0xf0]  ;;  %v1228_v16 = vor.u32 %v1400_v13, %v1227_v12  ;;  %v1219_v18 = vld [vmem:[#allocation4 + $0x40] sm:$0xf]  ;;  %v1398_v19 = vld [vmem:[#allocation4 + $0x44] sm:$0xf0] }
  0x37   : > { %v1232_v17 = vor.u32 %v1399_v14, %v1229_v15  ;;  %v1397_v20 = vld [vmem:[#allocation4 + $0x44] sm:$0xf]  ;;  %v1221_v21 = vld [vmem:[#allocation4 + $0x48] sm:$0xf0]  ;;  %v1220_v22 = vor.u32 %v1398_v19, %v1219_v18  ;;  %v1211_v24 = vld [vmem:[#allocation4 + $0x30] sm:$0xf] }
  0x38   : > { %v1224_v23 = vor.u32 %v1397_v20, %v1221_v21  ;;  %v1396_v25 = vld [vmem:[#allocation4 + $0x34] sm:$0xf0]  ;;  %v1395_v26 = vld [vmem:[#allocation4 + $0x34] sm:$0xf]  ;;  %v1213_v27 = vld [vmem:[#allocation4 + $0x38] sm:$0xf0] }
  0x39   : > { %466 = vmatpush.bf16.msra.mxu0 %v1236_v10  ;;  %1438 = vmatpush.bf16.msra.mxu2 %v1236_v10  ;;  %v1212_v28 = vor.u32 %v1396_v25, %v1211_v24  ;;  %v1216_v29 = vor.u32 %v1395_v26, %v1213_v27  ;;  %v1203_v30 = vld [vmem:[#allocation4 + $0x20] sm:$0xf]  ;;  %v1394_v31 = vld [vmem:[#allocation4 + $0x24] sm:$0xf0]  ;;  %v1393_v32 = vld [vmem:[#allocation4 + $0x24] sm:$0xf] }
  0x3a   : > { %515 = vmatpush.bf16.msra.mxu1 %v1240_v11  ;;  %1446 = vmatpush.bf16.msra.mxu3 %v1240_v11  ;;  %v1205_v33 = vld [vmem:[#allocation4 + $0x28] sm:$0xf0]  ;;  %v1204_v34 = vor.u32 %v1394_v31, %v1203_v30  ;;  %v1195_v36 = vld [vmem:[#allocation4 + $0x10] sm:$0xf]  ;;  %v1392_v37 = vld [vmem:[#allocation4 + $0x14] sm:$0xf0] }
  0x3b   : > { %v1208_v35 = vor.u32 %v1393_v32, %v1205_v33  ;;  %v1391_v38 = vld [vmem:[#allocation4 + $0x14] sm:$0xf]  ;;  %v1197_v39 = vld [vmem:[#allocation4 + $0x18] sm:$0xf0]  ;;  %v1196_v40 = vor.u32 %v1392_v37, %v1195_v36  ;;  %v1187_v42 = vld [vmem:[#allocation4] sm:$0xf] }
  0x3c   : > { %v1200_v41 = vor.u32 %v1391_v38, %v1197_v39  ;;  %v1390_v43 = vld [vmem:[#allocation4 + $0x4] sm:$0xf0]  ;;  %v1389_v44 = vld [vmem:[#allocation4 + $0x4] sm:$0xf]  ;;  %v1189_v45 = vld [vmem:[#allocation4 + $0x8] sm:$0xf0] }
  0x3d   : > { %467 = vmatpush.bf16.msra.mxu0 %v1228_v16  ;;  %1439 = vmatpush.bf16.msra.mxu2 %v1228_v16  ;;  %v1188_v46 = vor.u32 %v1390_v43, %v1187_v42  ;;  %v1192_v47 = vor.u32 %v1389_v44, %v1189_v45  ;;  %v1381_v48 = vld [vmem:[%s1824_s18] sm:$0xff]  ;;  %v1382_v49 = vld [vmem:[%s1824_s18 + $0x8] sm:$0xff]  ;;  %v1307_v51 = vld [vmem:[#allocation7 + $0x70] sm:$0xf]  ;;  %s1150_s23 = sshll.u32 %s1135_s22, 4 }
  0x3e   : > { %516 = vmatpush.bf16.msra.mxu1 %v1232_v17  ;;  %1447 = vmatpush.bf16.msra.mxu3 %v1232_v17  ;;  %v1385_v50 = vld [vmem:[%s1824_s18 + $0x20] sm:$0xff]  ;;  %v1420_v52 = vld [vmem:[#allocation7 + $0x74] sm:$0xf0]  ;;  %v1371_v53 = vld [vmem:[#allocation7 + $0xf0] sm:$0xf]  ;;  %p293_p1 = scmp.lt.s32.totalorder %s1150_s23, 31 }
  0x3f   : > { %v1436_v54 = vld [vmem:[#allocation7 + $0xf4] sm:$0xf0]  ;;  %v1308_v55 = vor.u32 %v1420_v52, %v1307_v51  ;;  %v1419_v57 = vld [vmem:[#allocation7 + $0x74] sm:$0xf]  ;;  %v1309_v58 = vld [vmem:[#allocation7 + $0x78] sm:$0xf0] }
  0x40   : > { %v1372_v56 = vor.u32 %v1436_v54, %v1371_v53  ;;  %v1312_v59 = vor.u32 %v1419_v57, %v1309_v58  ;;  %v1299_v60 = vld [vmem:[#allocation7 + $0x60] sm:$0xf]  ;;  %v1418_v61 = vld [vmem:[#allocation7 + $0x64] sm:$0xf0]  ;;  %v1435_v62 = vld [vmem:[#allocation7 + $0xf4] sm:$0xf] }
  0x41   : > { %468 = vmatpush.bf16.msra.mxu0 %v1220_v22  ;;  %1440 = vmatpush.bf16.msra.mxu2 %v1220_v22  ;;  %v1300_v63 = vor.u32 %v1418_v61, %v1299_v60  ;;  %v1373_v0 = vld [vmem:[#allocation7 + $0xf8] sm:$0xf0]  ;;  %v1363_v1 = vld [vmem:[#allocation7 + $0xe0] sm:$0xf]  ;;  %v1434_v2 = vld [vmem:[#allocation7 + $0xe4] sm:$0xf0] }
  0x42   : > { %517 = vmatpush.bf16.msra.mxu1 %v1224_v23  ;;  %1448 = vmatpush.bf16.msra.mxu3 %v1224_v23  ;;  %v1376_v3 = vor.u32 %v1435_v62, %v1373_v0  ;;  %v1364_v4 = vor.u32 %v1434_v2, %v1363_v1  ;;  %v1417_v5 = vld [vmem:[#allocation7 + $0x64] sm:$0xf]  ;;  %v1301_v6 = vld [vmem:[#allocation7 + $0x68] sm:$0xf0]  ;;  %v1291_v7 = vld [vmem:[#allocation7 + $0x50] sm:$0xf] }
  0x43   : > { %v1304_v8 = vor.u32 %v1417_v5, %v1301_v6  ;;  %v1416_v9 = vld [vmem:[#allocation7 + $0x54] sm:$0xf0]  ;;  %v1433_v10 = vld [vmem:[#allocation7 + $0xe4] sm:$0xf]  ;;  %v1365_v11 = vld [vmem:[#allocation7 + $0xe8] sm:$0xf0] }
  0x44   : > { %v1368_v12 = vor.u32 %v1433_v10, %v1365_v11  ;;  %v1355_v13 = vld [vmem:[#allocation7 + $0xd0] sm:$0xf]  ;;  %v1432_v14 = vld [vmem:[#allocation7 + $0xd4] sm:$0xf0]  ;;  %v1292_v15 = vor.u32 %v1416_v9, %v1291_v7  ;;  %v1386_v18 = vld [vmem:[%s1824_s18 + $0x28] sm:$0xff]  ;;  %s1989_s23 = smov (!%p293_p1, %s1150_s23), 31 }
  0x45   : > { %469 = vmatpush.bf16.msra.mxu0 %v1212_v28  ;;  %1441 = vmatpush.bf16.msra.mxu2 %v1212_v28  ;;  %v1356_v16 = vor.u32 %v1432_v14, %v1355_v13  ;;  %v1383_v17 = vld [vmem:[%s1824_s18 + $0x10] sm:$0xff]  ;;  %v1293_v20 = vld [vmem:[#allocation7 + $0x58] sm:$0xf0]  ;;  %v1283_v21 = vld [vmem:[#allocation7 + $0x40] sm:$0xf]  ;;  %s1380_s6 = sshll.u32 %s1989_s23, 4 }
  0x46   : > { %518 = vmatpush.bf16.msra.mxu1 %v1216_v29  ;;  %1449 = vmatpush.bf16.msra.mxu3 %v1216_v29  ;;  %v1415_v19 = vld [vmem:[#allocation7 + $0x54] sm:$0xf]  ;;  %v1414_v23 = vld [vmem:[#allocation7 + $0x44] sm:$0xf0]  ;;  %v1357_v25 = vld [vmem:[#allocation7 + $0xd8] sm:$0xf0]  ;;  %s1893_s11 = scalar_lea.vmem %s1978_s5, %s1380_s6 }
  0x47   : > { %v1296_v22 = vor.u32 %v1415_v19, %v1293_v20  ;;  %v1431_v24 = vld [vmem:[#allocation7 + $0xd4] sm:$0xf]  ;;  %v1284_v26 = vor.u32 %v1414_v23, %v1283_v21  ;;  %v1347_v28 = vld [vmem:[#allocation7 + $0xc0] sm:$0xf]  ;;  %v1430_v29 = vld [vmem:[#allocation7 + $0xc4] sm:$0xf0] }
  0x48   : > { %v1360_v27 = vor.u32 %v1431_v24, %v1357_v25  ;;  %v1413_v30 = vld [vmem:[#allocation7 + $0x44] sm:$0xf]  ;;  %v1348_v31 = vor.u32 %v1430_v29, %v1347_v28  ;;  %v1285_v32 = vld [vmem:[#allocation7 + $0x48] sm:$0xf0]  ;;  %v1275_v33 = vld [vmem:[#allocation7 + $0x30] sm:$0xf] }
  0x49   : > { %470 = vmatpush.bf16.msra.mxu0 %v1204_v34  ;;  %1442 = vmatpush.bf16.msra.mxu2 %v1204_v34  ;;  %v1412_v34 = vld [vmem:[#allocation7 + $0x34] sm:$0xf0]  ;;  %v1429_v37 = vld [vmem:[#allocation7 + $0xc4] sm:$0xf]  ;;  %v1349_v38 = vld [vmem:[#allocation7 + $0xc8] sm:$0xf0] }
  0x4a   : > { %519 = vmatpush.bf16.msra.mxu1 %v1208_v35  ;;  %1450 = vmatpush.bf16.msra.mxu3 %v1208_v35  ;;  %v1288_v35 = vor.u32 %v1413_v30, %v1285_v32  ;;  %v1276_v36 = vor.u32 %v1412_v34, %v1275_v33  ;;  %v1339_v39 = vld [vmem:[#allocation7 + $0xb0] sm:$0xf]  ;;  %v1411_v42 = vld [vmem:[#allocation7 + $0x34] sm:$0xf]  ;;  %v1277_v43 = vld [vmem:[#allocation7 + $0x38] sm:$0xf0] }
  0x4b   : > { %v1267_v45 = vld [vmem:[#allocation7 + $0x20] sm:$0xf]  ;;  %v1426_v51 = vld [vmem:[#allocation7 + $0xa4] sm:$0xf0]  ;;  %v1409_v54 = vld [vmem:[#allocation7 + $0x24] sm:$0xf] }
  0x4c   : > { %v1259_v58 = vld [vmem:[#allocation7 + $0x10] sm:$0xf]  ;;  %v1425_v60 = vld [vmem:[#allocation7 + $0xa4] sm:$0xf]  ;;  %v1333_v61 = vld [vmem:[#allocation7 + $0xa8] sm:$0xf0] }
  0x4d   : > { %471 = vmatpush.bf16.msra.mxu0 %v1196_v40  ;;  %1443 = vmatpush.bf16.msra.mxu2 %v1196_v40  ;;  %v1352_v40 = vor.u32 %v1429_v37, %v1349_v38  ;;  %v1336_v1 = vor.u32 %v1425_v60, %v1333_v61  ;;  %v1388_v2 = vld [vmem:[%s1824_s18 + $0x38] sm:$0xff]  ;;  %v1406_v9 = vld [vmem:[#allocation7 + $0x4] sm:$0xf0]  ;;  %v1253_v19 = vld [vmem:[#allocation7 + $0x8] sm:$0xf0] }
  0x4e   : > { %520 = vmatpush.bf16.msra.mxu1 %v1200_v41  ;;  %1451 = vmatpush.bf16.msra.mxu3 %v1200_v41  ;;  %v1428_v41 = vld [vmem:[#allocation7 + $0xb4] sm:$0xf0]  ;;  %v1407_v5 = vld [vmem:[#allocation7 + $0x14] sm:$0xf]  ;;  %v1261_v7 = vld [vmem:[#allocation7 + $0x18] sm:$0xf0] }
  0x4f   : > { %v1340_v44 = vor.u32 %v1428_v41, %v1339_v39  ;;  %v1264_v10 = vor.u32 %v1407_v5, %v1261_v7  ;;  %v1325_v13 = vld [vmem:[#allocation7 + $0x98] sm:$0xf0]  ;;  %v1421_v20 = vld [vmem:[#allocation7 + $0x84] sm:$0xf]  ;;  %v1317_v21 = vld [vmem:[#allocation7 + $0x88] sm:$0xf0] }
  0x50   : > { %v1320_v23 = vor.u32 %v1421_v20, %v1317_v21  ;;  %v331_v24 = vld [vmem:[#allocation6] sm:$0x3] }
  0x51   : > { %472 = vmatpush.bf16.msra.mxu0 %v1188_v46  ;;  %1444 = vmatpush.bf16.msra.mxu2 %v1188_v46  ;;  %v1410_v46 = vld [vmem:[#allocation7 + $0x24] sm:$0xf0]  ;;  %v1848_v28 = vperm.slane %v331_v24, 1 }
  0x52   : > { %521 = vmatpush.bf16.msra.mxu1 %v1192_v47  ;;  %1452 = vmatpush.bf16.msra.mxu3 %v1192_v47  ;;  %v1427_v47 = vld [vmem:[#allocation7 + $0xb4] sm:$0xf]  ;;  %v1268_v52 = vor.u32 %v1410_v46, %v1267_v45 }
  0x54   : > { %473 = vmatmul.bf16.vlgmr.msra.gmra.mxu0 %v1381_v48  ;;  %493 = vmatmul.bf16.vlgmr.msra.gmra.mxu2 %v1385_v50 }
  0x55   : > { %522 = vmatmul.bf16.vlgmr.msra.gmra.mxu1 %v1381_v48  ;;  %542 = vmatmul.bf16.vlgmr.msra.gmra.mxu3 %v1385_v50  ;;  %v1280_v48 = vor.u32 %v1411_v42, %v1277_v43  ;;  %v1331_v50 = vld [vmem:[#allocation7 + $0xa0] sm:$0xf] }
  0x56   : > { %809 = vmatpush.bf16.msrb.mxu2 %v1308_v55  ;;  %858 = vmatpush.bf16.msrb.mxu3 %v1372_v56  ;;  %v1269_v55 = vld [vmem:[#allocation7 + $0x28] sm:$0xf0]  ;;  %v1384_v56 = vld [vmem:[%s1824_s18 + $0x18] sm:$0xff]  ;;  %v1332_v57 = vor.u32 %v1426_v51, %v1331_v50 }
  0x57   : > { %907 = vmatpush.bf16.msrb.mxu0 %v1312_v59  ;;  %956 = vmatpush.bf16.msrb.mxu1 %v1376_v3  ;;  %v1408_v59 = vld [vmem:[#allocation7 + $0x14] sm:$0xf0]  ;;  %v1272_v62 = vor.u32 %v1409_v54, %v1269_v55  ;;  %v1323_v3 = vld [vmem:[#allocation7 + $0x90] sm:$0xf] }
  0x58   : > { %v1260_v0 = vor.u32 %v1408_v59, %v1259_v58 }
  0x5a   : > { %810 = vmatpush.bf16.msrb.mxu2 %v1300_v63  ;;  %859 = vmatpush.bf16.msrb.mxu3 %v1364_v4  ;;  %v1387_v63 = vld [vmem:[%s1824_s18 + $0x30] sm:$0xff]  ;;  %v1424_v4 = vld [vmem:[#allocation7 + $0x94] sm:$0xf0] }
  0x5b   : > { %908 = vmatpush.bf16.msrb.mxu0 %v1304_v8  ;;  %957 = vmatpush.bf16.msrb.mxu1 %v1368_v12  ;;  %v1324_v6 = vor.u32 %v1424_v4, %v1323_v3  ;;  %v1251_v8 = vld [vmem:[#allocation7] sm:$0xf]  ;;  %v1423_v12 = vld [vmem:[#allocation7 + $0x94] sm:$0xf] }
  0x5c   : > { %v1252_v11 = vor.u32 %v1406_v9, %v1251_v8  ;;  %v1328_v14 = vor.u32 %v1423_v12, %v1325_v13 }
  0x5e   : > { %811 = vmatpush.bf16.msrb.mxu2 %v1292_v15  ;;  %860 = vmatpush.bf16.msrb.mxu3 %v1356_v16  ;;  %v1315_v15 = vld [vmem:[#allocation7 + $0x80] sm:$0xf]  ;;  %v1422_v16 = vld [vmem:[#allocation7 + $0x84] sm:$0xf0] }
  0x5f   : > { %909 = vmatpush.bf16.msrb.mxu0 %v1296_v22  ;;  %958 = vmatpush.bf16.msrb.mxu1 %v1360_v27  ;;  %v1846_v27 = vperm.slane %v331_v24, 0 }
  0x62   : > { %812 = vmatpush.bf16.msrb.mxu2 %v1284_v26  ;;  %861 = vmatpush.bf16.msrb.mxu3 %v1348_v31 }
  0x63   : > { %910 = vmatpush.bf16.msrb.mxu0 %v1288_v35  ;;  %959 = vmatpush.bf16.msrb.mxu1 %v1352_v40 }
  0x64   : > { %478 = vmatmul.bf16.gmra.mxu0 %v1382_v49  ;;  %498 = vmatmul.bf16.gmra.mxu2 %v1386_v18 }
  0x65   : > { %527 = vmatmul.bf16.gmra.mxu1 %v1382_v49  ;;  %547 = vmatmul.bf16.gmra.mxu3 %v1386_v18  ;;  %v1341_v49 = vld [vmem:[#allocation7 + $0xb8] sm:$0xf0]  ;;  %v1316_v18 = vor.u32 %v1422_v16, %v1315_v15 }
  0x66   : > { %813 = vmatpush.bf16.msrb.mxu2 %v1276_v36  ;;  %v1344_v53 = vor.u32 %v1427_v47, %v1341_v49  ;;  %862 = vmatpush.bf16.msrb.mxu3 %v1340_v44 }
  0x67   : > { %911 = vmatpush.bf16.msrb.mxu0 %v1280_v48 }
  0x68   : > { %960 = vmatpush.bf16.msrb.mxu1 %v1344_v53 }
  0x6a   : > { %814 = vmatpush.bf16.msrb.mxu2 %v1268_v52  ;;  %863 = vmatpush.bf16.msrb.mxu3 %v1332_v57 }
  0x6b   : > { %912 = vmatpush.bf16.msrb.mxu0 %v1272_v62 }
  0x6c   : > { %961 = vmatpush.bf16.msrb.mxu1 %v1336_v1 }
  0x6e   : > { %815 = vmatpush.bf16.msrb.mxu2 %v1260_v0  ;;  %864 = vmatpush.bf16.msrb.mxu3 %v1324_v6 }
  0x6f   : > { %913 = vmatpush.bf16.msrb.mxu0 %v1264_v10 }
  0x70   : > { %962 = vmatpush.bf16.msrb.mxu1 %v1328_v14 }
  0x72   : > { %816 = vmatpush.bf16.msrb.mxu2 %v1252_v11  ;;  %865 = vmatpush.bf16.msrb.mxu3 %v1316_v18 }
  0x74   : > { %483 = vmatmul.bf16.gmra.mxu0 %v1383_v17  ;;  %503 = vmatmul.bf16.gmra.mxu2 %v1387_v63 }
  0x75   : > { %532 = vmatmul.bf16.gmra.mxu1 %v1383_v17  ;;  %552 = vmatmul.bf16.gmra.mxu3 %v1387_v63  ;;  %v1405_v17 = vld [vmem:[#allocation7 + $0x4] sm:$0xf] }
  0x76   : > { %v1256_v22 = vor.u32 %v1405_v17, %v1253_v19  ;;  %963 = vmatpush.bf16.msrb.mxu1 %v1320_v23 }
  0x78   : > { %914 = vmatpush.bf16.msrb.mxu0 %v1256_v22 }
  0x84   : > { %488 = vmatmul.bf16.gmra.mxu0 %v1384_v56  ;;  %508 = vmatmul.bf16.gmra.mxu2 %v1388_v2 }
  0x85   : > { %537 = vmatmul.bf16.gmra.mxu1 %v1384_v56  ;;  %557 = vmatmul.bf16.gmra.mxu3 %v1388_v2 }
  0xd1   : > { %v474_v25 = vpop.f32.mrf.mxu0 }
  0xd2   : > { %v523_v26 = vpop.f32.mrf.mxu1  ;;  %v475_v29 = vadd.f32 %v474_v25, %v1846_v27 }
  0xd3   : > { %v524_v30 = vadd.f32 %v523_v26, %v1848_v28 }
  0xd4   : > { %v563_v35 = vmax.f32 %v475_v29, 0.0 }
  0xd5   : > { %v564_v37 = vmax.f32 %v524_v30, 0.0 }
  0xd7   : > { %v494_v3 = vpop.f32.mrf.mxu2 }
  0xd8   : > { %v543_v5 = vpop.f32.mrf.mxu3  ;;  %v495_v25 = vadd.f32 %v494_v3, %v1846_v27 }
  0xd9   : > { %v476_v31 = vpop.f32.mrf.mxu0  ;;  %v544_v29 = vadd.f32 %v543_v5, %v1848_v28 }
  0xda   : > { %v477_v32 = vadd.f32 %v476_v31, %v1846_v27  ;;  %v525_v33 = vpop.f32.mrf.mxu1  ;;  %v579_v31 = vmax.f32 %v495_v25, 0.0 }
  0xdb   : > { %v526_v34 = vadd.f32 %v525_v33, %v1848_v28  ;;  %v580_v33 = vmax.f32 %v544_v29, 0.0 }
  0xdc   : > { %v565_v36 = vmax.f32 %v477_v32, 0.0 }
  0xdd   : > { %v566_v38 = vmax.f32 %v526_v34, 0.0 }
  0xde   : > { %v595_v39 = vpack.c.bf16 %v565_v36, %v563_v35 }
  0xdf   : > { %v596_v40 = vpack.c.bf16 %v566_v38, %v564_v37  ;;  %v496_v9 = vpop.f32.mrf.mxu2 }
  0xe0   : > { %817 = vmatmul.bf16.vlgmr.msrb.gmra.mxu2 %v595_v39  ;;  %915 = vmatmul.bf16.vlgmr.msrb.gmra.mxu0 %v595_v39  ;;  %v545_v11 = vpop.f32.mrf.mxu3  ;;  %v497_v26 = vadd.f32 %v496_v9, %v1846_v27 }
  0xe1   : > { %866 = vmatmul.bf16.vlgmr.msrb.gmra.mxu3 %v596_v40  ;;  %964 = vmatmul.bf16.vlgmr.msrb.gmra.mxu1 %v596_v40  ;;  %v479_v41 = vpop.f32.mrf.mxu0  ;;  %v546_v30 = vadd.f32 %v545_v11, %v1848_v28 }
  0xe2   : > { %v528_v42 = vpop.f32.mrf.mxu1  ;;  %v480_v43 = vadd.f32 %v479_v41, %v1846_v27  ;;  %v581_v32 = vmax.f32 %v497_v26, 0.0 }
  0xe3   : > { %v529_v44 = vadd.f32 %v528_v42, %v1848_v28  ;;  %v582_v34 = vmax.f32 %v546_v30, 0.0 }
  0xe4   : > { %v567_v49 = vmax.f32 %v480_v43, 0.0  ;;  %v603_v37 = vpack.c.bf16 %v581_v32, %v579_v31 }
  0xe5   : > { %v568_v51 = vmax.f32 %v529_v44, 0.0  ;;  %v604_v38 = vpack.c.bf16 %v582_v34, %v580_v33 }
  0xe7   : > { %v499_v23 = vpop.f32.mrf.mxu2 }
  0xe8   : > { %v548_v24 = vpop.f32.mrf.mxu3  ;;  %v500_v40 = vadd.f32 %v499_v23, %v1846_v27 }
  0xe9   : > { %v481_v45 = vpop.f32.mrf.mxu0  ;;  %v549_v43 = vadd.f32 %v548_v24, %v1848_v28 }
  0xea   : > { %v482_v46 = vadd.f32 %v481_v45, %v1846_v27  ;;  %v530_v47 = vpop.f32.mrf.mxu1  ;;  %v583_v45 = vmax.f32 %v500_v40, 0.0 }
  0xeb   : > { %v531_v48 = vadd.f32 %v530_v47, %v1848_v28  ;;  %v584_v47 = vmax.f32 %v549_v43, 0.0 }
  0xec   : > { %v569_v50 = vmax.f32 %v482_v46, 0.0 }
  0xed   : > { %v570_v52 = vmax.f32 %v531_v48, 0.0 }
  0xee   : > { %v597_v53 = vpack.c.bf16 %v569_v50, %v567_v49 }
  0xef   : > { %v598_v54 = vpack.c.bf16 %v570_v52, %v568_v51  ;;  %v501_v35 = vpop.f32.mrf.mxu2 }
  0xf0   : > { %822 = vmatmul.bf16.gmra.mxu2 %v597_v53  ;;  %920 = vmatmul.bf16.gmra.mxu0 %v597_v53  ;;  %v550_v36 = vpop.f32.mrf.mxu3  ;;  %v502_v41 = vadd.f32 %v501_v35, %v1846_v27 }
  0xf1   : > { %871 = vmatmul.bf16.gmra.mxu3 %v598_v54  ;;  %969 = vmatmul.bf16.gmra.mxu1 %v598_v54  ;;  %v484_v55 = vpop.f32.mrf.mxu0  ;;  %v551_v44 = vadd.f32 %v550_v36, %v1848_v28 }
  0xf2   : > { %v533_v56 = vpop.f32.mrf.mxu1  ;;  %v485_v57 = vadd.f32 %v484_v55, %v1846_v27  ;;  %v585_v46 = vmax.f32 %v502_v41, 0.0 }
  0xf3   : > { %v534_v58 = vadd.f32 %v533_v56, %v1848_v28  ;;  %v586_v48 = vmax.f32 %v551_v44, 0.0 }
  0xf4   : > { %v571_v63 = vmax.f32 %v485_v57, 0.0  ;;  %v605_v49 = vpack.c.bf16 %v585_v46, %v583_v45 }
  0xf5   : > { %v572_v1 = vmax.f32 %v534_v58, 0.0  ;;  %v606_v50 = vpack.c.bf16 %v586_v48, %v584_v47 }
  0xf7   : > { %v504_v39 = vpop.f32.mrf.mxu2 }
  0xf8   : > { %v553_v42 = vpop.f32.mrf.mxu3  ;;  %v505_v53 = vadd.f32 %v504_v39, %v1846_v27 }
  0xf9   : > { %v486_v59 = vpop.f32.mrf.mxu0  ;;  %v554_v55 = vadd.f32 %v553_v42, %v1848_v28 }
  0xfa   : > { %v487_v60 = vadd.f32 %v486_v59, %v1846_v27  ;;  %v535_v61 = vpop.f32.mrf.mxu1  ;;  %v587_v58 = vmax.f32 %v505_v53, 0.0 }
  0xfb   : > { %v536_v62 = vadd.f32 %v535_v61, %v1848_v28  ;;  %v588_v61 = vmax.f32 %v554_v55, 0.0 }
  0xfc   : > { %v573_v0 = vmax.f32 %v487_v60, 0.0 }
  0xfd   : > { %v574_v2 = vmax.f32 %v536_v62, 0.0 }
  0xfe   : > { %v599_v4 = vpack.c.bf16 %v573_v0, %v571_v63 }
  0xff   : > { %v600_v6 = vpack.c.bf16 %v574_v2, %v572_v1  ;;  %v506_v51 = vpop.f32.mrf.mxu2 }
 0x100   : > { %827 = vmatmul.bf16.gmra.mxu2 %v599_v4  ;;  %925 = vmatmul.bf16.gmra.mxu0 %v599_v4  ;;  %v555_v52 = vpop.f32.mrf.mxu3  ;;  %v507_v54 = vadd.f32 %v506_v51, %v1846_v27 }
 0x101   : > { %876 = vmatmul.bf16.gmra.mxu3 %v600_v6  ;;  %974 = vmatmul.bf16.gmra.mxu1 %v600_v6  ;;  %v489_v7 = vpop.f32.mrf.mxu0  ;;  %v556_v56 = vadd.f32 %v555_v52, %v1848_v28 }
 0x102   : > { %v538_v8 = vpop.f32.mrf.mxu1  ;;  %v490_v10 = vadd.f32 %v489_v7, %v1846_v27  ;;  %v589_v59 = vmax.f32 %v507_v54, 0.0 }
 0x103   : > { %v539_v12 = vadd.f32 %v538_v8, %v1848_v28  ;;  %v590_v62 = vmax.f32 %v556_v56, 0.0 }
 0x104   : > { %v575_v17 = vmax.f32 %v490_v10, 0.0  ;;  %v607_v63 = vpack.c.bf16 %v589_v59, %v587_v58 }
 0x105   : > { %v576_v19 = vmax.f32 %v539_v12, 0.0  ;;  %v608_v0 = vpack.c.bf16 %v590_v62, %v588_v61 }
 0x107   : > { %v509_v57 = vpop.f32.mrf.mxu2 }
 0x108   : > { %v558_v60 = vpop.f32.mrf.mxu3  ;;  %v510_v3 = vadd.f32 %v509_v57, %v1846_v27 }
 0x109   : > { %v491_v13 = vpop.f32.mrf.mxu0  ;;  %v559_v5 = vadd.f32 %v558_v60, %v1848_v28 }
 0x10a   : > { %v492_v14 = vadd.f32 %v491_v13, %v1846_v27  ;;  %v540_v15 = vpop.f32.mrf.mxu1  ;;  %v591_v7 = vmax.f32 %v510_v3, 0.0 }
 0x10b   : > { %v541_v16 = vadd.f32 %v540_v15, %v1848_v28  ;;  %v592_v9 = vmax.f32 %v559_v5, 0.0 }
 0x10c   : > { %v577_v18 = vmax.f32 %v492_v14, 0.0 }
 0x10d   : > { %v578_v20 = vmax.f32 %v541_v16, 0.0 }
 0x10e   : > { %v601_v21 = vpack.c.bf16 %v577_v18, %v575_v17 }
 0x10f   : > { %v602_v22 = vpack.c.bf16 %v578_v20, %v576_v19  ;;  %v511_v1 = vpop.f32.mrf.mxu2 }
 0x110   : > { %832 = vmatmul.bf16.gmra.mxu2 %v601_v21  ;;  %930 = vmatmul.bf16.gmra.mxu0 %v601_v21  ;;  %v560_v2 = vpop.f32.mrf.mxu3  ;;  %v512_v4 = vadd.f32 %v511_v1, %v1846_v27  ;;  %v643_v27 = vld [vmem:[%s1977_s4] sm:$0x3] }
 0x111   : > { %881 = vmatmul.bf16.gmra.mxu3 %v602_v22  ;;  %979 = vmatmul.bf16.gmra.mxu1 %v602_v22  ;;  %v561_v6 = vadd.f32 %v560_v2, %v1848_v28  ;;  %v1887_v13 = vperm.slane %v643_v27, 1  ;;  %v1895_v17 = vperm.slane %v643_v27, 0 }
 0x112   : > { %v593_v8 = vmax.f32 %v512_v4, 0.0 }
 0x113   : > { %v594_v10 = vmax.f32 %v561_v6, 0.0 }
 0x114   : > { %v609_v11 = vpack.c.bf16 %v593_v8, %v591_v7 }
 0x115   : > { %v610_v12 = vpack.c.bf16 %v594_v10, %v592_v9 }
 0x120   : > { %837 = vmatmul.bf16.gmra.mxu2 %v603_v37  ;;  %935 = vmatmul.bf16.gmra.mxu0 %v603_v37 }
 0x121   : > { %886 = vmatmul.bf16.gmra.mxu3 %v604_v38  ;;  %984 = vmatmul.bf16.gmra.mxu1 %v604_v38 }
 0x130   : > { %842 = vmatmul.bf16.gmra.mxu2 %v605_v49  ;;  %940 = vmatmul.bf16.gmra.mxu0 %v605_v49 }
 0x131   : > { %891 = vmatmul.bf16.gmra.mxu3 %v606_v50  ;;  %989 = vmatmul.bf16.gmra.mxu1 %v606_v50 }
 0x140   : > { %847 = vmatmul.bf16.gmra.mxu2 %v607_v63  ;;  %945 = vmatmul.bf16.gmra.mxu0 %v607_v63 }
 0x141   : > { %896 = vmatmul.bf16.gmra.mxu3 %v608_v0  ;;  %994 = vmatmul.bf16.gmra.mxu1 %v608_v0 }
 0x150   : > { %852 = vmatmul.bf16.gmra.mxu2 %v609_v11  ;;  %950 = vmatmul.bf16.gmra.mxu0 %v609_v11 }
 0x151   : > { %901 = vmatmul.bf16.gmra.mxu3 %v610_v12  ;;  %999 = vmatmul.bf16.gmra.mxu1 %v610_v12 }
 0x15d   : > { %v916_v28 = vpop.f32.mrf.mxu0 }
 0x15e   : > { %v917_v14 = vadd.f32 %v916_v28, %v1887_v13  ;;  %v965_v15 = vpop.f32.mrf.mxu1 }
 0x160   : > { %v966_v16 = vadd.f32 %v965_v15, %v917_v14 }
 0x162   : > { %1006 = vst [vmem:[%s1893_s11 + $0x8] sm:$0xff] %v966_v16 }
 0x163   : > { %v818_v18 = vpop.f32.mrf.mxu2 }
 0x164   : > { %v819_v19 = vadd.f32 %v818_v18, %v1895_v17  ;;  %v867_v20 = vpop.f32.mrf.mxu3 }
 0x165   : > { %v918_v21 = vpop.f32.mrf.mxu0 }
 0x166   : > { %v868_v22 = vadd.f32 %v867_v20, %v819_v19  ;;  %v919_v23 = vadd.f32 %v918_v21, %v1887_v13  ;;  %v967_v24 = vpop.f32.mrf.mxu1 }
 0x168   : > { %1005 = vst [vmem:[%s1893_s11] sm:$0xff] %v868_v22  ;;  %v968_v25 = vadd.f32 %v967_v24, %v919_v23 }
 0x16a   : > { %1008 = vst [vmem:[%s1893_s11 + $0x18] sm:$0xff] %v968_v25 }
 0x16b   : > { %v820_v26 = vpop.f32.mrf.mxu2 }
 0x16c   : > { %v821_v29 = vadd.f32 %v820_v26, %v1895_v17  ;;  %v869_v30 = vpop.f32.mrf.mxu3 }
 0x16d   : > { %v921_v31 = vpop.f32.mrf.mxu0 }
 0x16e   : > { %v870_v32 = vadd.f32 %v869_v30, %v821_v29  ;;  %v922_v33 = vadd.f32 %v921_v31, %v1887_v13  ;;  %v970_v34 = vpop.f32.mrf.mxu1 }
 0x170   : > { %1007 = vst [vmem:[%s1893_s11 + $0x10] sm:$0xff] %v870_v32  ;;  %v971_v35 = vadd.f32 %v970_v34, %v922_v33 }
 0x172   : > { %1010 = vst [vmem:[%s1893_s11 + $0x28] sm:$0xff] %v971_v35 }
 0x173   : > { %v823_v36 = vpop.f32.mrf.mxu2 }
 0x174   : > { %v824_v37 = vadd.f32 %v823_v36, %v1895_v17  ;;  %v872_v38 = vpop.f32.mrf.mxu3 }
 0x175   : > { %v923_v39 = vpop.f32.mrf.mxu0 }
 0x176   : > { %v873_v40 = vadd.f32 %v872_v38, %v824_v37  ;;  %v924_v41 = vadd.f32 %v923_v39, %v1887_v13  ;;  %v972_v42 = vpop.f32.mrf.mxu1 }
 0x178   : > { %1009 = vst [vmem:[%s1893_s11 + $0x20] sm:$0xff] %v873_v40  ;;  %v973_v43 = vadd.f32 %v972_v42, %v924_v41 }
 0x17a   : > { %1012 = vst [vmem:[%s1893_s11 + $0x38] sm:$0xff] %v973_v43 }
 0x17b   : > { %v825_v44 = vpop.f32.mrf.mxu2 }
 0x17c   : > { %v826_v45 = vadd.f32 %v825_v44, %v1895_v17  ;;  %v874_v46 = vpop.f32.mrf.mxu3 }
 0x17d   : > { %v926_v47 = vpop.f32.mrf.mxu0 }
 0x17e   : > { %v875_v48 = vadd.f32 %v874_v46, %v826_v45  ;;  %v927_v49 = vadd.f32 %v926_v47, %v1887_v13  ;;  %v975_v50 = vpop.f32.mrf.mxu1 }
 0x180   : > { %1011 = vst [vmem:[%s1893_s11 + $0x30] sm:$0xff] %v875_v48  ;;  %v976_v51 = vadd.f32 %v975_v50, %v927_v49 }
 0x182   : > { %1014 = vst [vmem:[%s1893_s11 + $0x48] sm:$0xff] %v976_v51 }
 0x183   : > { %v828_v52 = vpop.f32.mrf.mxu2 }
 0x184   : > { %v829_v53 = vadd.f32 %v828_v52, %v1895_v17  ;;  %v877_v54 = vpop.f32.mrf.mxu3 }
 0x185   : > { %v928_v55 = vpop.f32.mrf.mxu0 }
 0x186   : > { %v878_v56 = vadd.f32 %v877_v54, %v829_v53  ;;  %v929_v57 = vadd.f32 %v928_v55, %v1887_v13  ;;  %v977_v58 = vpop.f32.mrf.mxu1 }
 0x188   : > { %1013 = vst [vmem:[%s1893_s11 + $0x40] sm:$0xff] %v878_v56  ;;  %v978_v59 = vadd.f32 %v977_v58, %v929_v57 }
 0x18a   : > { %1016 = vst [vmem:[%s1893_s11 + $0x58] sm:$0xff] %v978_v59 }
 0x18b   : > { %v830_v60 = vpop.f32.mrf.mxu2 }
 0x18c   : > { %v831_v61 = vadd.f32 %v830_v60, %v1895_v17  ;;  %v879_v62 = vpop.f32.mrf.mxu3 }
 0x18d   : > { %v931_v63 = vpop.f32.mrf.mxu0 }
 0x18e   : > { %v880_v0 = vadd.f32 %v879_v62, %v831_v61  ;;  %v932_v1 = vadd.f32 %v931_v63, %v1887_v13  ;;  %v980_v2 = vpop.f32.mrf.mxu1 }
 0x190   : > { %1015 = vst [vmem:[%s1893_s11 + $0x50] sm:$0xff] %v880_v0  ;;  %v981_v3 = vadd.f32 %v980_v2, %v932_v1 }
 0x192   : > { %1018 = vst [vmem:[%s1893_s11 + $0x68] sm:$0xff] %v981_v3 }
 0x193   : > { %v833_v4 = vpop.f32.mrf.mxu2 }
 0x194   : > { %v834_v5 = vadd.f32 %v833_v4, %v1895_v17  ;;  %v882_v6 = vpop.f32.mrf.mxu3 }
 0x195   : > { %v933_v7 = vpop.f32.mrf.mxu0 }
 0x196   : > { %v883_v8 = vadd.f32 %v882_v6, %v834_v5  ;;  %v934_v9 = vadd.f32 %v933_v7, %v1887_v13  ;;  %v982_v10 = vpop.f32.mrf.mxu1 }
 0x198   : > { %1017 = vst [vmem:[%s1893_s11 + $0x60] sm:$0xff] %v883_v8  ;;  %v983_v11 = vadd.f32 %v982_v10, %v934_v9 }
 0x19a   : > { %1020 = vst [vmem:[%s1893_s11 + $0x78] sm:$0xff] %v983_v11 }
 0x19b   : > { %v835_v12 = vpop.f32.mrf.mxu2 }
 0x19c   : > { %v836_v27 = vadd.f32 %v835_v12, %v1895_v17  ;;  %v884_v28 = vpop.f32.mrf.mxu3 }
 0x19d   : > { %v936_v14 = vpop.f32.mrf.mxu0 }
 0x19e   : > { %v885_v15 = vadd.f32 %v884_v28, %v836_v27  ;;  %v937_v16 = vadd.f32 %v936_v14, %v1887_v13  ;;  %v985_v18 = vpop.f32.mrf.mxu1 }
 0x1a0   : > { %1019 = vst [vmem:[%s1893_s11 + $0x70] sm:$0xff] %v885_v15  ;;  %v986_v19 = vadd.f32 %v985_v18, %v937_v16 }
 0x1a2   : > { %1022 = vst [vmem:[%s1893_s11 + $0x88] sm:$0xff] %v986_v19 }
 0x1a3   : > { %v838_v20 = vpop.f32.mrf.mxu2 }
 0x1a4   : > { %v839_v21 = vadd.f32 %v838_v20, %v1895_v17  ;;  %v887_v22 = vpop.f32.mrf.mxu3 }
 0x1a5   : > { %v938_v23 = vpop.f32.mrf.mxu0 }
 0x1a6   : > { %v888_v24 = vadd.f32 %v887_v22, %v839_v21  ;;  %v939_v25 = vadd.f32 %v938_v23, %v1887_v13  ;;  %v987_v26 = vpop.f32.mrf.mxu1 }
 0x1a8   : > { %1021 = vst [vmem:[%s1893_s11 + $0x80] sm:$0xff] %v888_v24  ;;  %v988_v29 = vadd.f32 %v987_v26, %v939_v25 }
 0x1aa   : > { %1024 = vst [vmem:[%s1893_s11 + $0x98] sm:$0xff] %v988_v29 }
 0x1ab   : > { %v840_v30 = vpop.f32.mrf.mxu2 }
 0x1ac   : > { %v841_v31 = vadd.f32 %v840_v30, %v1895_v17  ;;  %v889_v32 = vpop.f32.mrf.mxu3 }
 0x1ad   : > { %v941_v33 = vpop.f32.mrf.mxu0 }
 0x1ae   : > { %v890_v34 = vadd.f32 %v889_v32, %v841_v31  ;;  %v942_v35 = vadd.f32 %v941_v33, %v1887_v13  ;;  %v990_v36 = vpop.f32.mrf.mxu1 }
 0x1b0   : > { %1023 = vst [vmem:[%s1893_s11 + $0x90] sm:$0xff] %v890_v34  ;;  %v991_v37 = vadd.f32 %v990_v36, %v942_v35 }
 0x1b2   : > { %1026 = vst [vmem:[%s1893_s11 + $0xa8] sm:$0xff] %v991_v37 }
 0x1b3   : > { %v843_v38 = vpop.f32.mrf.mxu2 }
 0x1b4   : > { %v844_v39 = vadd.f32 %v843_v38, %v1895_v17  ;;  %v892_v40 = vpop.f32.mrf.mxu3 }
 0x1b5   : > { %v943_v41 = vpop.f32.mrf.mxu0 }
 0x1b6   : > { %v893_v42 = vadd.f32 %v892_v40, %v844_v39  ;;  %v944_v43 = vadd.f32 %v943_v41, %v1887_v13  ;;  %v992_v44 = vpop.f32.mrf.mxu1 }
 0x1b8   : > { %1025 = vst [vmem:[%s1893_s11 + $0xa0] sm:$0xff] %v893_v42  ;;  %v993_v45 = vadd.f32 %v992_v44, %v944_v43 }
 0x1ba   : > { %1028 = vst [vmem:[%s1893_s11 + $0xb8] sm:$0xff] %v993_v45 }
 0x1bb   : > { %v845_v46 = vpop.f32.mrf.mxu2 }
 0x1bc   : > { %v846_v47 = vadd.f32 %v845_v46, %v1895_v17  ;;  %v894_v48 = vpop.f32.mrf.mxu3 }
 0x1bd   : > { %v946_v49 = vpop.f32.mrf.mxu0 }
 0x1be   : > { %v895_v50 = vadd.f32 %v894_v48, %v846_v47  ;;  %v947_v51 = vadd.f32 %v946_v49, %v1887_v13  ;;  %v995_v52 = vpop.f32.mrf.mxu1 }
 0x1c0   : > { %1027 = vst [vmem:[%s1893_s11 + $0xb0] sm:$0xff] %v895_v50  ;;  %v996_v53 = vadd.f32 %v995_v52, %v947_v51 }
 0x1c2   : > { %1030 = vst [vmem:[%s1893_s11 + $0xc8] sm:$0xff] %v996_v53 }
 0x1c3   : > { %v848_v54 = vpop.f32.mrf.mxu2 }
 0x1c4   : > { %v849_v55 = vadd.f32 %v848_v54, %v1895_v17  ;;  %v897_v56 = vpop.f32.mrf.mxu3 }
 0x1c5   : > { %v948_v57 = vpop.f32.mrf.mxu0 }
 0x1c6   : > { %v898_v58 = vadd.f32 %v897_v56, %v849_v55  ;;  %v949_v59 = vadd.f32 %v948_v57, %v1887_v13  ;;  %v997_v60 = vpop.f32.mrf.mxu1 }
 0x1c8   : > { %1029 = vst [vmem:[%s1893_s11 + $0xc0] sm:$0xff] %v898_v58  ;;  %v998_v61 = vadd.f32 %v997_v60, %v949_v59 }
 0x1ca   : > { %1032 = vst [vmem:[%s1893_s11 + $0xd8] sm:$0xff] %v998_v61 }
 0x1cb   : > { %v850_v62 = vpop.f32.mrf.mxu2 }
 0x1cc   : > { %v851_v63 = vadd.f32 %v850_v62, %v1895_v17  ;;  %v899_v0 = vpop.f32.mrf.mxu3 }
 0x1cd   : > { %v951_v1 = vpop.f32.mrf.mxu0 }
 0x1ce   : > { %v900_v2 = vadd.f32 %v899_v0, %v851_v63  ;;  %v952_v3 = vadd.f32 %v951_v1, %v1887_v13  ;;  %v1000_v4 = vpop.f32.mrf.mxu1 }
 0x1d0   : > { %1031 = vst [vmem:[%s1893_s11 + $0xd0] sm:$0xff] %v900_v2  ;;  %v1001_v5 = vadd.f32 %v1000_v4, %v952_v3 }
 0x1d2   : > { %1034 = vst [vmem:[%s1893_s11 + $0xe8] sm:$0xff] %v1001_v5 }
 0x1d3   : > { %v853_v6 = vpop.f32.mrf.mxu2 }
 0x1d4   : > { %v854_v7 = vadd.f32 %v853_v6, %v1895_v17  ;;  %v902_v8 = vpop.f32.mrf.mxu3 }
 0x1d5   : > { %v953_v9 = vpop.f32.mrf.mxu0 }
 0x1d6   : > { %v903_v10 = vadd.f32 %v902_v8, %v854_v7  ;;  %v954_v11 = vadd.f32 %v953_v9, %v1887_v13  ;;  %v1002_v12 = vpop.f32.mrf.mxu1 }
 0x1d8   : > { %1033 = vst [vmem:[%s1893_s11 + $0xe0] sm:$0xff] %v903_v10  ;;  %v1003_v27 = vadd.f32 %v1002_v12, %v954_v11 }
 0x1da   : > { %1036 = vst [vmem:[%s1893_s11 + $0xf8] sm:$0xff] %v1003_v27 }
 0x1db   : > { %v855_v28 = vpop.f32.mrf.mxu2 }
 0x1dc   : > { %v856_v14 = vadd.f32 %v855_v28, %v1895_v17  ;;  %v904_v15 = vpop.f32.mrf.mxu3 }
 0x1de   : > { %v905_v16 = vadd.f32 %v904_v15, %v856_v14 }
 0x1e0   : > { %1035 = vst [vmem:[%s1893_s11 + $0xf0] sm:$0xff] %v905_v16 }
 0x1e1 PF: > { %p17_p4 = scmp.ge.s32.totalorder %s1788_s25, 4   ;;  %s1984_s18 = smov %s1681_s19 }
 0x1e2   : > { %s1985_s19 = smov %s1685_s20  ;;  %s1986_s20 = smov %s1800_s29 }
 0x1e3   : > { %s1987_s21 = smov %s1788_s25  ;;  %19 = sbr.rel (!%p17_p4) target bundleno = 5 (0x5), region = 92 }
 0x1e8   :  { %1061 = vsyncpa [#allocation3], 1 }
 0x1e9   :  { %1063 = vsyncpa [#allocation3 + $0x1], 1 }
 0x1ea   :  { %1064 = vsyncpa [#allocation5], 1 }
 0x1eb   :  { %1065 = vsyncpa [#allocation8], 1 }

</bundles_post_ra>
